<compile_context>
chip_gen: v6e
topology: v6e:2x2x1
jax: 0.10.0
libtpu: 0.0.40
codegen_flags: <defaults>
</compile_context>

<pallas_src>
import math

import jax
import jax.numpy as jnp
from jax.experimental import pallas as pl
from jax.experimental.pallas import tpu as pltpu


def _round_up(n, m):
    return ((n + m - 1) // m) * m


# ---------------------------------------------------------------------------
# Kernels
# ---------------------------------------------------------------------------

def _cp_folded_kernel(xf_ref, vb_ref, g_ref, wd_ref, o_ref):
    """Lane-dense path: `fold` batch rows packed into the 128-lane axis.

    xf : (TB, fold*x_dim)  with fold*x_dim == 128           (pipelined)
    vb : (fold*x_dim, fold*k) = kron(I_fold, sqrt(0.5)*V)   (resident)
    g  : (fold*k, fold)       = kron(I_fold, ones(k,1))     (resident)
    wd : (fold*x_dim, fold)   = kron(I_fold, 0.5*sum_k V^2) (resident)
    o  : (TB, fold)
    """
    xf = xf_ref[...]
    # sqrt(0.5)-scaled interaction sums for every packed row: one MXU matmul.
    sf = jnp.dot(xf, vb_ref[...], preferred_element_type=jnp.float32)      # (TB, fold*k)
    # 0.5 * sum_k s^2, group-reduced per packed row on the MXU (keeps XLU free).
    sq = jnp.dot(sf * sf, g_ref[...], preferred_element_type=jnp.float32)  # (TB, fold)
    # 0.5 * sum_i x_i^2 * sum_k V_ik^2
    xf32 = xf.astype(jnp.float32)
    ss = jnp.dot(xf32 * xf32, wd_ref[...], preferred_element_type=jnp.float32)
    o_ref[...] = (sq - ss).astype(o_ref.dtype)


def _cp_kernel(x_ref, v_ref, w_ref, o_ref):
    """Fallback path (x_dim does not fold cleanly into 128 lanes, or B % fold != 0).

    x : (TB, x_dim)   (pipelined)
    v : (x_dim, k)    = sqrt(0.5) * V     (resident)
    w : (1, x_dim)    = 0.5 * sum_k V^2   (resident)
    o : (TB,)         lane-dense 1-D output
    """
    x = x_ref[...]
    s = jnp.dot(x, v_ref[...], preferred_element_type=jnp.float32)   # (TB, k)
    sq = jnp.sum(s * s, axis=1)                                       # (TB,)
    x32 = x.astype(jnp.float32)
    ss = jnp.sum((x32 * x32) * w_ref[...], axis=1)                    # (TB,)
    o_ref[...] = (sq - ss).astype(o_ref.dtype)


# ---------------------------------------------------------------------------
# Tile selection
# ---------------------------------------------------------------------------

def _choose_block_rows(rows, *, hbm_bytes_per_row, vmem_bytes_per_row,
                       target_step_bytes, vmem_budget_bytes):
    """Rows per grid step.

    Big enough that each step DMAs ~target_step_bytes of x (amortizes the ~0.35us fixed
    per-step pipeline cost), small enough that the per-step VMEM working set stays under
    vmem_budget_bytes (v7x: 64 MiB physical / 32 MiB scoped), and -- for large batches --
    at least 2 steps so both v7x TensorCores get work from the "parallel" batch axis.
    """
    tb = pl.cdiv(target_step_bytes, hbm_bytes_per_row)
    tb_cap = max(vmem_budget_bytes // vmem_bytes_per_row, 8)
    tb = max(min(tb, tb_cap), 8)
    if tb >= rows:
        if rows < 1024:
            return rows, 1                 # single block == full array dims (always legal)
        tb = pl.cdiv(rows, 2)              # give both v7x TensorCores work
    tb = _round_up(tb, 128)
    return tb, pl.cdiv(rows, tb)


# ---------------------------------------------------------------------------
# Wrapper
# ---------------------------------------------------------------------------

def cross_product(x, vparam, *, target_step_bytes=4 << 20, vmem_budget_bytes=20 << 20):
    """x: (B, x_dim) f32/bf16, vparam: (x_dim, k) f32 -> (B, 1) f32 (== CrossProduct.forward)."""
    B, x_dim = x.shape
    xd, k = vparam.shape
    assert xd == x_dim
    itemsize = jnp.dtype(x.dtype).itemsize
    mxu_dtype = jnp.bfloat16 if x.dtype == jnp.bfloat16 else jnp.float32

    v32 = vparam.astype(jnp.float32)
    vs = v32 * math.sqrt(0.5)                    # sqrt(0.5): folds the 0.5 into s^2
    w = 0.5 * jnp.sum(v32 * v32, axis=1)         # (x_dim,)   0.5 * sum_k V^2

    compiler_params = pltpu.CompilerParams(
        dimension_semantics=("parallel",),       # megacore sharding on v7x
        vmem_limit_bytes=32 << 20,               # explicit: v5e scoped default is only 16 MiB
    )

    # Lane-dense "folded" layout: pack `fold` batch rows into the 128-lane axis.
    fold = 128 // x_dim if (0 < x_dim < 128 and 128 % x_dim == 0) else 1

    if fold > 1 and B % fold == 0:
        rows, lane = B // fold, fold * x_dim     # lane == 128
        xf = x.reshape(rows, lane)               # row-major reshape: free, no data movement
        eye = jnp.eye(fold, dtype=jnp.float32)
        vblock = (eye[:, None, :, None] * vs[None, :, None, :]        # kron(I_fold, sqrt(.5)V)
                  ).reshape(lane, fold * k).astype(mxu_dtype)
        gmat = jnp.repeat(eye, k, axis=0)                              # kron(I_fold, 1_k)
        wd = (eye[:, None, :] * w[None, :, None]).reshape(lane, fold)  # kron(I_fold, w)

        # Conservative per-row VMEM estimate (f32 worst case, no temp reuse):
        # 2x double-buffered x tile + x^2 temps + s and s^2 + reduced/output tiles.
        vmem_row = 4 * (2 * lane + 2 * lane + 2 * max(fold * k, 128) + 2 * 128)
        tb, steps = _choose_block_rows(
            rows, hbm_bytes_per_row=lane * itemsize, vmem_bytes_per_row=vmem_row,
            target_step_bytes=target_step_bytes, vmem_budget_bytes=vmem_budget_bytes)

        out = pl.pallas_call(
            _cp_folded_kernel,
            out_shape=jax.ShapeDtypeStruct((rows, fold), jnp.float32),
            grid=(steps,),                                   # ragged last block: no jnp.pad
            in_specs=[
                pl.BlockSpec((tb, lane), lambda i: (i, 0)),          # pipelined x tile
                pl.BlockSpec((lane, fold * k), lambda i: (0, 0)),    # resident params
                pl.BlockSpec((fold * k, fold), lambda i: (0, 0)),
                pl.BlockSpec((lane, fold), lambda i: (0, 0)),
            ],
            out_specs=pl.BlockSpec((tb, fold), lambda i: (i, 0)),
            compiler_params=compiler_params,
        )(xf, vblock, gmat, wd)
        return out.reshape(B, 1)

    # Fallback: lane-sparse x tile, lane-dense 1-D output, ragged last block (no jnp.pad).
    # NOTE: for very large x_dim a second "arbitrary" grid axis over x_dim with VMEM
    # accumulators would keep the tile bounded; not needed at these sizes.
    lanes_x = _round_up(x_dim, 128)
    lanes_k = _round_up(k, 128)
    vmem_row = 4 * (2 * lanes_x + 2 * lanes_x + 2 * lanes_k + 2 * 128)
    tb, steps = _choose_block_rows(
        B, hbm_bytes_per_row=x_dim * itemsize, vmem_bytes_per_row=vmem_row,
        target_step_bytes=target_step_bytes, vmem_budget_bytes=vmem_budget_bytes)

    out = pl.pallas_call(
        _cp_kernel,
        out_shape=jax.ShapeDtypeStruct((B,), jnp.float32),
        grid=(steps,),
        in_specs=[
            pl.BlockSpec((tb, x_dim), lambda i: (i, 0)),     # pipelined x tile
            pl.BlockSpec((x_dim, k), lambda i: (0, 0)),      # resident params
            pl.BlockSpec((1, x_dim), lambda i: (0, 0)),
        ],
        out_specs=pl.BlockSpec((tb,), lambda i: (i,)),       # lane-dense 1-D output
        compiler_params=compiler_params,
    )(x, vs.astype(mxu_dtype), w[None, :])
    return out[:, None]


def cross_product_ref(x, vparam):
    """Pure-JAX reference matching the PyTorch forward literally."""
    xv = x[:, :, None] * vparam[None, :, :]            # == diag_embed(x) @ V
    square_of_sum = jnp.sum(xv, axis=1) ** 2
    sum_of_square = jnp.sum(xv ** 2, axis=1)
    return 0.5 * jnp.sum(square_of_sum - sum_of_square, axis=1, keepdims=True)


if __name__ == "__main__":
    B, x_dim, v_dim = 8, 16, 32

    key = jax.random.PRNGKey(0)
    kx, kv = jax.random.split(key)

    # Deterministic parameter init mirroring reset_parameter(): uniform(-stdv, stdv), stdv=1/sqrt(k)
    stdv = 1.0 / math.sqrt(v_dim)
    vparam = jax.random.uniform(
        kv, (x_dim, v_dim), dtype=jnp.float32, minval=-stdv, maxval=stdv
    )
    x = jax.random.normal(kx, (B, x_dim), dtype=jnp.float32)

    # 1) Small batch: folded (lane-dense) path, single block.
    out = jax.block_until_ready(cross_product(x, vparam))
    ref = jax.block_until_ready(cross_product_ref(x, vparam))
    assert out.shape == (B, 1), out.shape
    assert jnp.allclose(out, ref, atol=1e-4, rtol=1e-4), (out, ref)

    # 2) B % fold != 0: unfolded fallback, >=2 grid steps, ragged last block (no jnp.pad).
    B2 = 2500
    x2 = jax.random.normal(jax.random.PRNGKey(1), (B2, x_dim), dtype=jnp.float32)
    out2 = jax.block_until_ready(cross_product(x2, vparam))
    ref2 = jax.block_until_ready(cross_product_ref(x2, vparam))
    assert out2.shape == (B2, 1), out2.shape
    assert jnp.allclose(out2, ref2, atol=1e-4, rtol=1e-4)

    # 3) Folded path with a multi-step pipelined grid (small step target forces several steps).
    B3 = 4096
    x3 = jax.random.normal(jax.random.PRNGKey(2), (B3, x_dim), dtype=jnp.float32)
    out3 = jax.block_until_ready(cross_product(x3, vparam, target_step_bytes=64 << 10))
    ref3 = jax.block_until_ready(cross_product_ref(x3, vparam))
    assert out3.shape == (B3, 1), out3.shape
    assert jnp.allclose(out3, ref3, atol=1e-4, rtol=1e-4)

    print("KERNEL_OK")
</pallas_src>

<mosaic_0001>
module attributes {stable_mosaic.version = 11 : i64} {
  func.func @_cp_folded_kernel(%arg0: i32, %arg1: memref<1x128xf32, #tpu.memory_space<vmem>>, %arg2: memref<128x256xf32, #tpu.memory_space<vmem>>, %arg3: memref<256x8xf32, #tpu.memory_space<vmem>>, %arg4: memref<128x8xf32, #tpu.memory_space<vmem>>, %arg5: memref<1x8xf32, #tpu.memory_space<vmem>>) attributes {dimension_semantics = [#tpu.dimension_semantics<parallel>], iteration_bounds = array<i64: 1>, scalar_prefetch = 0 : i64, scratch_operands = 0 : i64, tpu.core_type = #tpu.core_type<tc>, window_params = [{transform_indices = @transform_0, window_bounds = array<i64: 1, 128>}, {pipeline_mode = #tpu.pipeline_mode<synchronous>, transform_indices = @transform_1, window_bounds = array<i64: 128, 256>}, {pipeline_mode = #tpu.pipeline_mode<synchronous>, transform_indices = @transform_2, window_bounds = array<i64: 256, 8>}, {pipeline_mode = #tpu.pipeline_mode<synchronous>, transform_indices = @transform_3, window_bounds = array<i64: 128, 8>}, {transform_indices = @transform_4, window_bounds = array<i64: 1, 8>}]} {
    %c0 = arith.constant 0 : index
    %c0_0 = arith.constant 0 : index
    %0 = vector.load %arg1[%c0, %c0_0] : memref<1x128xf32, #tpu.memory_space<vmem>>, vector<1x128xf32>
    %c0_1 = arith.constant 0 : index
    %c0_2 = arith.constant 0 : index
    %1 = vector.load %arg2[%c0_1, %c0_2] : memref<128x256xf32, #tpu.memory_space<vmem>>, vector<128x256xf32>
    %cst = arith.constant dense<0.000000e+00> : vector<1x256xf32>
    %2 = tpu.matmul %0, %1, %cst {dimension_numbers = #tpu.dot_dimension_numbers<[1], [0], [0], [1], [0, 0, 1, 1], [], []>} : vector<1x128xf32>, vector<128x256xf32>, vector<1x256xf32> -> vector<1x256xf32>
    %3 = arith.mulf %2, %2 : vector<1x256xf32>
    %c0_3 = arith.constant 0 : index
    %c0_4 = arith.constant 0 : index
    %4 = vector.load %arg3[%c0_3, %c0_4] : memref<256x8xf32, #tpu.memory_space<vmem>>, vector<256x8xf32>
    %cst_5 = arith.constant dense<0.000000e+00> : vector<1x8xf32>
    %5 = tpu.matmul %3, %4, %cst_5 {dimension_numbers = #tpu.dot_dimension_numbers<[1], [0], [0], [1], [0, 0, 1, 1], [], []>} : vector<1x256xf32>, vector<256x8xf32>, vector<1x8xf32> -> vector<1x8xf32>
    %6 = arith.mulf %0, %0 : vector<1x128xf32>
    %c0_6 = arith.constant 0 : index
    %c0_7 = arith.constant 0 : index
    %7 = vector.load %arg4[%c0_6, %c0_7] : memref<128x8xf32, #tpu.memory_space<vmem>>, vector<128x8xf32>
    %cst_8 = arith.constant dense<0.000000e+00> : vector<1x8xf32>
    %8 = tpu.matmul %6, %7, %cst_8 {dimension_numbers = #tpu.dot_dimension_numbers<[1], [0], [0], [1], [0, 0, 1, 1], [], []>} : vector<1x128xf32>, vector<128x8xf32>, vector<1x8xf32> -> vector<1x8xf32>
    %9 = arith.subf %5, %8 : vector<1x8xf32>
    %c0_9 = arith.constant 0 : index
    %c0_10 = arith.constant 0 : index
    %10 = vector.load %arg5[%c0_9, %c0_10] : memref<1x8xf32, #tpu.memory_space<vmem>>, vector<1x8xf32>
    tpu.vector_store %arg5[%c0_9, %c0_10], %9 {strides = array<i32>} : memref<1x8xf32, #tpu.memory_space<vmem>>, vector<1x8xf32>,
    return
  }
  func.func @transform_0(%arg0: i32) -> (i32, i32) {
    %c0_i32 = arith.constant 0 : i32
    %c0_i32_0 = arith.constant 0 : i32
    return %arg0, %c0_i32 : i32, i32
  }
  func.func @transform_1(%arg0: i32) -> (i32, i32) {
    %c0_i32 = arith.constant 0 : i32
    %c0_i32_0 = arith.constant 0 : i32
    %c0_i32_1 = arith.constant 0 : i32
    return %c0_i32, %c0_i32_0 : i32, i32
  }
  func.func @transform_2(%arg0: i32) -> (i32, i32) {
    %c0_i32 = arith.constant 0 : i32
    %c0_i32_0 = arith.constant 0 : i32
    %c0_i32_1 = arith.constant 0 : i32
    return %c0_i32, %c0_i32_0 : i32, i32
  }
  func.func @transform_3(%arg0: i32) -> (i32, i32) {
    %c0_i32 = arith.constant 0 : i32
    %c0_i32_0 = arith.constant 0 : i32
    %c0_i32_1 = arith.constant 0 : i32
    return %c0_i32, %c0_i32_0 : i32, i32
  }
  func.func @transform_4(%arg0: i32) -> (i32, i32) {
    %c0_i32 = arith.constant 0 : i32
    %c0_i32_0 = arith.constant 0 : i32
    return %arg0, %c0_i32 : i32, i32
  }
}

</mosaic_0001>

<bundles_post_ra>
// kernel: tpu_custom_call.1
= control target key start
LH: loop header
LB: loop body
LE: loop exit
PB: predicated region body
PF: predicated region fallthrough
CT: control target
= control target key end

     0   :  { %v442_v4 = vmov 0.0   ;;  %s739_s0 = inlined_call_operand.vmem [shape: f32[1,128], index: 0, kind: input, shape index: {}]   ;;  %s740_s1 = inlined_call_operand.vmem [shape: f32[128,256], index: 1, kind: input, shape index: {}]   ;;  %s741_s2 = inlined_call_operand.vmem [shape: f32[256,8], index: 2, kind: input, shape index: {}]   ;;  %s742_s3 = inlined_call_operand.vmem [shape: f32[128,8], index: 3, kind: input, shape index: {}]   ;;  %s743_s4 = inlined_call_operand.hbm [shape: f32[1,8], index: 4, kind: output, shape index: {}]  }
   0x1   :  { %v50_v0 = vld [vmem:[%s740_s1 + $0xf8] sm:$0xff]  ;;  %v49_v1 = vld [vmem:[%s740_s1 + $0xf0] sm:$0xff]  ;;  %v48_v2 = vld [vmem:[%s740_s1 + $0xe8] sm:$0xff]  ;;  %115 = vmatprep.mubr.f32.mxu0 %v442_v4 }
   0x2   :  { %51 = vmatprep.subr.mxu0 %v50_v0  ;;  %v47_v3 = vld [vmem:[%s740_s1 + $0xe0] sm:$0xff]  ;;  %v46_v5 = vld [vmem:[%s740_s1 + $0xd8] sm:$0xff]  ;;  %v45_v6 = vld [vmem:[%s740_s1 + $0xd0] sm:$0xff] }
   0x3   :  { %52 = vmatpush1.msra.mxu0 %v49_v1  ;;  %v44_v7 = vld [vmem:[%s740_s1 + $0xc8] sm:$0xff]  ;;  %v43_v8 = vld [vmem:[%s740_s1 + $0xc0] sm:$0xff]  ;;  %v42_v9 = vld [vmem:[%s740_s1 + $0xb8] sm:$0xff] }
   0x4   :  { %53 = vmatprep.subr.mxu0 %v48_v2  ;;  %v41_v10 = vld [vmem:[%s740_s1 + $0xb0] sm:$0xff]  ;;  %v40_v11 = vld [vmem:[%s740_s1 + $0xa8] sm:$0xff]  ;;  %v39_v12 = vld [vmem:[%s740_s1 + $0xa0] sm:$0xff] }
   0x5   :  { %54 = vmatpush1.msra.mxu0 %v47_v3  ;;  %v38_v13 = vld [vmem:[%s740_s1 + $0x98] sm:$0xff]  ;;  %v37_v14 = vld [vmem:[%s740_s1 + $0x90] sm:$0xff]  ;;  %v36_v18 = vld [vmem:[%s740_s1 + $0x88] sm:$0xff] }
   0x6   :  { %55 = vmatprep.subr.mxu0 %v46_v5  ;;  %v155_v15 = vld [vmem:[%s741_s2 + $0xf8] sm:$0xff]  ;;  %v154_v17 = vld [vmem:[%s741_s2 + $0xf0] sm:$0xff]  ;;  %v35_v20 = vld [vmem:[%s740_s1 + $0x80] sm:$0xff] }
   0x7   :  { %56 = vmatpush1.msra.mxu0 %v45_v6  ;;  %v139_v16 = vld [vmem:[%s741_s2 + $0x78] sm:$0xff]  ;;  %330 = vmatprep.subr.mxu1 %v155_v15  ;;  %v138_v19 = vld [vmem:[%s741_s2 + $0x70] sm:$0xff]  ;;  %v153_v21 = vld [vmem:[%s741_s2 + $0xe8] sm:$0xff] }
   0x8   :  { %57 = vmatprep.subr.mxu0 %v44_v7  ;;  %331 = vmatpush3.msra.mxu1 %v139_v16  ;;  %v34_v22 = vld [vmem:[%s740_s1 + $0x78] sm:$0xff]  ;;  %v137_v23 = vld [vmem:[%s741_s2 + $0x68] sm:$0xff]  ;;  %v33_v24 = vld [vmem:[%s740_s1 + $0x70] sm:$0xff] }
   0x9   :  { %58 = vmatpush1.msra.mxu0 %v43_v8  ;;  %332 = vmatprep.subr.mxu1 %v154_v17  ;;  %v152_v25 = vld [vmem:[%s741_s2 + $0xe0] sm:$0xff]  ;;  %v32_v26 = vld [vmem:[%s740_s1 + $0x68] sm:$0xff]  ;;  %v151_v29 = vld [vmem:[%s741_s2 + $0xd8] sm:$0xff] }
   0xa   :  { %59 = vmatprep.subr.mxu0 %v42_v9  ;;  %333 = vmatpush3.msra.mxu1 %v138_v19  ;;  %v136_v27 = vld [vmem:[%s741_s2 + $0x60] sm:$0xff]  ;;  %v30_v30 = vld [vmem:[%s740_s1 + $0x58] sm:$0xff]  ;;  %v29_v32 = vld [vmem:[%s740_s1 + $0x50] sm:$0xff] }
   0xb   :  { %60 = vmatpush1.msra.mxu0 %v41_v10  ;;  %334 = vmatprep.subr.mxu1 %v153_v21  ;;  %v31_v28 = vld [vmem:[%s740_s1 + $0x60] sm:$0xff]  ;;  %v135_v31 = vld [vmem:[%s741_s2 + $0x58] sm:$0xff]  ;;  %v150_v33 = vld [vmem:[%s741_s2 + $0xd0] sm:$0xff] }
   0xc   :  { %61 = vmatprep.subr.mxu0 %v40_v11  ;;  %335 = vmatpush3.msra.mxu1 %v137_v23  ;;  %v28_v34 = vld [vmem:[%s740_s1 + $0x48] sm:$0xff]  ;;  %v134_v35 = vld [vmem:[%s741_s2 + $0x50] sm:$0xff]  ;;  %v27_v36 = vld [vmem:[%s740_s1 + $0x40] sm:$0xff] }
   0xd   :  { %62 = vmatpush1.msra.mxu0 %v39_v12  ;;  %336 = vmatprep.subr.mxu1 %v152_v25  ;;  %v149_v37 = vld [vmem:[%s741_s2 + $0xc8] sm:$0xff]  ;;  %v26_v38 = vld [vmem:[%s740_s1 + $0x38] sm:$0xff]  ;;  %v25_v40 = vld [vmem:[%s740_s1 + $0x30] sm:$0xff] }
   0xe   :  { %63 = vmatprep.subr.mxu0 %v38_v13  ;;  %337 = vmatpush3.msra.mxu1 %v136_v27  ;;  %v133_v39 = vld [vmem:[%s741_s2 + $0x48] sm:$0xff]  ;;  %v148_v41 = vld [vmem:[%s741_s2 + $0xc0] sm:$0xff] }
   0xf   :  { %64 = vmatpush1.msra.mxu0 %v37_v14  ;;  %338 = vmatprep.subr.mxu1 %v151_v29 }
  0x10   :  { %65 = vmatprep.subr.mxu0 %v36_v18  ;;  %339 = vmatpush3.msra.mxu1 %v135_v31 }
  0x11   :  { %66 = vmatpush1.msra.mxu0 %v35_v20  ;;  %340 = vmatprep.subr.mxu1 %v150_v33 }
  0x12   :  { %67 = vmatprep.subr.mxu0 %v34_v22  ;;  %341 = vmatpush3.msra.mxu1 %v134_v35 }
  0x13   :  { %68 = vmatpush1.msra.mxu0 %v33_v24 }
  0x14   :  { %69 = vmatprep.subr.mxu0 %v32_v26 }
  0x15   :  { %70 = vmatpush1.msra.mxu0 %v31_v28 }
  0x16   :  { %71 = vmatprep.subr.mxu0 %v30_v30 }
  0x17   :  { %72 = vmatpush1.msra.mxu0 %v29_v32 }
  0x18   :  { %73 = vmatprep.subr.mxu0 %v28_v34 }
  0x19   :  { %9 = vsyncpa [#allocation3], 0  ;;  %74 = vmatpush1.msra.mxu0 %v27_v36  ;;  %v24_v42 = vld [vmem:[%s740_s1 + $0x28] sm:$0xff]  ;;  %342 = vmatprep.subr.mxu1 %v149_v37  ;;  %v132_v43 = vld [vmem:[%s741_s2 + $0x40] sm:$0xff]  ;;  %vm443_vm0 = vmmov 0   ;;  %vm314_vm1 = vcmask 57344  }
  0x1a   :  { %75 = vmatprep.subr.mxu0 %v26_v38  ;;  %v23_v44 = vld [vmem:[%s740_s1 + $0x20] sm:$0xff]  ;;  %343 = vmatpush3.msra.mxu1 %v133_v39  ;;  %v147_v45 = vld [vmem:[%s741_s2 + $0xb8] sm:$0xff]  ;;  %v21_v48 = vld [vmem:[%s740_s1 + $0x10] sm:$0xff] }
  0x1b   :  { %76 = vmatpush1.msra.mxu0 %v25_v40  ;;  %v22_v46 = vld [vmem:[%s740_s1 + $0x18] sm:$0xff]  ;;  %344 = vmatprep.subr.mxu1 %v148_v41  ;;  %v146_v49 = vld [vmem:[%s741_s2 + $0xb0] sm:$0xff]  ;;  %v20_v50 = vld [vmem:[%s740_s1 + $0x8] sm:$0xff] }
  0x1c   :  { %v131_v47 = vld [vmem:[%s741_s2 + $0x38] sm:$0xff]  ;;  %77 = vmatprep.subr.mxu0 %v24_v42  ;;  %345 = vmatpush3.msra.mxu1 %v132_v43  ;;  %v130_v51 = vld [vmem:[%s741_s2 + $0x30] sm:$0xff]  ;;  %v19_v52 = vld [vmem:[%s740_s1] sm:$0xff] }
  0x1d   :  { %78 = vmatpush1.msra.mxu0 %v23_v44  ;;  %346 = vmatprep.subr.mxu1 %v147_v45  ;;  %v145_v53 = vld [vmem:[%s741_s2 + $0xa8] sm:$0xff]  ;;  %v633_v54 = vld [vmem:[%s739_s0] sm:$0x1]  ;;  %v242_v55 = vld [vmem:[%s742_s3 + $0x78] sm:$0xff] }
  0x1e   :  { %79 = vmatprep.subr.mxu0 %v22_v46  ;;  %347 = vmatpush3.msra.mxu1 %v131_v47  ;;  %v129_v56 = vld [vmem:[%s741_s2 + $0x28] sm:$0xff]  ;;  %v144_v57 = vld [vmem:[%s741_s2 + $0xa0] sm:$0xff]  ;;  %v241_v58 = vld [vmem:[%s742_s3 + $0x70] sm:$0xff]  ;;  %v226_v17 = vmul.f32 %v633_v54, %v633_v54 }
  0x1f   :  { %80 = vmatpush1.msra.mxu0 %v21_v48  ;;  %348 = vmatprep.subr.mxu1 %v146_v49  ;;  %v128_v59 = vld [vmem:[%s741_s2 + $0x20] sm:$0xff]  ;;  %v143_v60 = vld [vmem:[%s741_s2 + $0x98] sm:$0xff]  ;;  %v240_v61 = vld [vmem:[%s742_s3 + $0x68] sm:$0xff] }
  0x20   :  { %81 = vmatprep.subr.mxu0 %v20_v50  ;;  %349 = vmatpush3.msra.mxu1 %v130_v51  ;;  %v127_v62 = vld [vmem:[%s741_s2 + $0x18] sm:$0xff]  ;;  %v239_v63 = vld [vmem:[%s742_s3 + $0x60] sm:$0xff]  ;;  %v237_v1 = vld [vmem:[%s742_s3 + $0x50] sm:$0xff] }
  0x21   :  { %82 = vmatpush1.msra.mxu0 %v19_v52  ;;  %350 = vmatprep.subr.mxu1 %v145_v53  ;;  %v238_v0 = vld [vmem:[%s742_s3 + $0x58] sm:$0xff]  ;;  %v236_v2 = vld [vmem:[%s742_s3 + $0x48] sm:$0xff]  ;;  %v235_v3 = vld [vmem:[%s742_s3 + $0x40] sm:$0xff] }
  0x22   :  { %116 = vmatmul.mubr.f32.vlgmr.msra.gmra.mxu0 %v633_v54  ;;  %382 = vmatprep.subr.mxu0 %v442_v4  ;;  %v234_v5 = vld [vmem:[%s742_s3 + $0x38] sm:$0xff]  ;;  %v233_v6 = vld [vmem:[%s742_s3 + $0x30] sm:$0xff]  ;;  %v232_v7 = vld [vmem:[%s742_s3 + $0x28] sm:$0xff] }
  0x23   :  { %383 = vmatpush3.msra.mxu0 %v242_v55  ;;  %351 = vmatpush3.msra.mxu1 %v129_v56  ;;  %v231_v8 = vld [vmem:[%s742_s3 + $0x20] sm:$0xff]  ;;  %v142_v9 = vld [vmem:[%s741_s2 + $0x90] sm:$0xff]  ;;  %v230_v11 = vld [vmem:[%s742_s3 + $0x18] sm:$0xff] }
  0x24   :  { %384 = vmatprep.subr.mxu0 %v442_v4  ;;  %352 = vmatprep.subr.mxu1 %v144_v57  ;;  %v126_v10 = vld [vmem:[%s741_s2 + $0x10] sm:$0xff]  ;;  %v141_v12 = vld [vmem:[%s741_s2 + $0x88] sm:$0xff]  ;;  %v140_v15 = vld [vmem:[%s741_s2 + $0x80] sm:$0xff] }
  0x25   :  { %385 = vmatpush3.msra.mxu0 %v241_v58  ;;  %353 = vmatpush3.msra.mxu1 %v128_v59  ;;  %v125_v13 = vld [vmem:[%s741_s2 + $0x8] sm:$0xff]  ;;  %v229_v14 = vld [vmem:[%s742_s3 + $0x10] sm:$0xff]  ;;  %v124_v16 = vld [vmem:[%s741_s2] sm:$0xff]  ;;  %s444_s2 = smov [#allocation2]  }
  0x26   :  { %386 = vmatprep.subr.mxu0 %v442_v4  ;;  %354 = vmatprep.subr.mxu1 %v143_v60  ;;  %v228_v18 = vld [vmem:[%s742_s3 + $0x8] sm:$0xff]  ;;  %v227_v19 = vld [vmem:[%s742_s3] sm:$0xff]  ;;  %s322_s17 = sshll.u32 %s444_s2, 4  ;;  %s323_s17 = int_to_ptr.vmem [resolvable:$true] %s322_s17 }
  0x27   :  { %387 = vmatpush3.msra.mxu0 %v240_v61  ;;  %355 = vmatpush3.msra.mxu1 %v127_v62  ;;  %s420_s3 = scalar_lea.vmem %s323_s17, 16  ;;  %s424_s18 = scalar_lea.vmem %s323_s17, 32 }
  0x28   :  { %388 = vmatprep.subr.mxu0 %v442_v4  ;;  %356 = vmatprep.subr.mxu1 %v142_v9  ;;  %p421_p0 = scmp.ne.s32.totalorder %s323_s17, %s420_s3  ;;  %p425_p1 = scmp.lt.s32.totalorder %s323_s17, %s323_s17 }
  0x29   :  { %389 = vmatpush3.msra.mxu0 %v239_v63  ;;  %357 = vmatpush3.msra.mxu1 %v126_v10  ;;  %p426_p2 = scmp.lt.s32.totalorder %s424_s18, %s420_s3 }
  0x2a   :  { %390 = vmatprep.subr.mxu0 %v442_v4  ;;  %358 = vmatprep.subr.mxu1 %v141_v12 }
  0x2b   :  { %391 = vmatpush3.msra.mxu0 %v238_v0  ;;  %359 = vmatpush3.msra.mxu1 %v125_v13  ;;  %p427_p3 = por %p426_p2, %p425_p1 }
  0x2c   :  { %392 = vmatprep.subr.mxu0 %v442_v4  ;;  %360 = vmatprep.subr.mxu1 %v140_v15 }
  0x2d   :  { %393 = vmatpush3.msra.mxu0 %v237_v1  ;;  %361 = vmatpush3.msra.mxu1 %v124_v16  ;;  %p428_p4 = pnand %p427_p3, %p421_p0 }
  0x2e   :  { %394 = vmatprep.subr.mxu0 %v442_v4  ;;  %414 = vmatprep.mubr.msk.f32.mxu0 %vm443_vm0, %v442_v4 }
  0x2f   :  { %395 = vmatpush3.msra.mxu0 %v236_v2 }
  0x30   :  { %396 = vmatprep.subr.mxu0 %v442_v4 }
  0x31   :  { %397 = vmatpush3.msra.mxu0 %v235_v3 }
  0x32   :  { %398 = vmatprep.subr.mxu0 %v442_v4 }
  0x33   :  { %399 = vmatpush3.msra.mxu0 %v234_v5 }
  0x34   :  { %400 = vmatprep.subr.mxu0 %v442_v4 }
  0x35   :  { %401 = vmatpush3.msra.mxu0 %v233_v6 }
  0x36   :  { %402 = vmatprep.subr.mxu0 %v442_v4 }
  0x37   :  { %403 = vmatpush3.msra.mxu0 %v232_v7 }
  0x38   :  { %404 = vmatprep.subr.mxu0 %v442_v4 }
  0x39   :  { %405 = vmatpush3.msra.mxu0 %v231_v8 }
  0x3a   :  { %406 = vmatprep.subr.mxu0 %v442_v4 }
  0x3b   :  { %407 = vmatpush3.msra.mxu0 %v230_v11 }
  0x3c   :  { %408 = vmatprep.subr.mxu0 %v442_v4 }
  0x3d   :  { %409 = vmatpush3.msra.mxu0 %v229_v14 }
  0x3e   :  { %410 = vmatprep.subr.mxu0 %v442_v4 }
  0x3f   :  { %411 = vmatpush3.msra.mxu0 %v228_v18 }
  0x40   :  { %412 = vmatprep.subr.mxu0 %v442_v4 }
  0x41   :  { %413 = vmatpush3.msra.mxu0 %v227_v19 }
  0x42   :  { %415 = vmatmul.mubr.f32.vlgmr.msra.gmra.mxu0 %v226_v17 }
  0xe2   :  { %v117_v20 = vpop.f32.mrf.mxu0 }
  0xe3   :  { %v122_v23 = vmul.f32 %v117_v20, %v117_v20 }
  0xe4   :  { %v119_v21 = vpop.f32.mrf.mxu0 }
  0xe5   :  { %v123_v22 = vmul.f32 %v119_v21, %v119_v21 }
  0xe7   :  { %220 = vmatprep.mubr.f32.mxu1 %v123_v22 }
  0xe8   :  { %221 = vmatmul.mubr.f32.vlgmr.msra.gmra.mxu1 %v122_v23 }
 0x102   :  { %v309_v24 = vpop.f32.mrf.mxu0 }
 0x104   :  { %v416_v25 = vpop.f32.mrf.mxu0 }
 0x1a8   :  { %v362_v26 = vpop.f32.mrf.mxu1 }
 0x1aa   :  { %v363_v27 = vpop.f32.mrf.mxu1 }
 0x1ab   :  { %v364_v28 = vadd.f32 %v363_v27, %v362_v26 }
 0x1ad   :  { %v313_v29 = vsub.f32 %v364_v28, %v309_v24 }
 0x1af   :  { %315 = vst.msk [vmem:[#allocation2] sm:$0x1] %vm314_vm1, %v313_v29 }
 0x1b0   :  { %431 = shalt.err (!%p428_p4)
}
 0x1b1   :  { %325 = dma.vmem_to_hbm [thread:$0]  %s323_s17, 16, %s743_s4, [#allocation3]  }
 0x1b2   :  { %440 = dma.done.wait [#allocation3], 16  }
 0x1b3   :  { %441 = vsyncadd [#allocation3], 4294967280 }
 0x1b4   :  { %329 = vsyncpa [#allocation3], 1 }

</bundles_post_ra>
